<compile_context>
chip_gen: v7x
topology: tpu7x:2x2x1
jax: 0.10.0
libtpu: 0.0.40
codegen_flags: <defaults>
</compile_context>

<pallas_src>
import math

import jax
import jax.numpy as jnp
from jax.experimental import pallas as pl
from jax.experimental.pallas import tpu as pltpu


def mlp_kernel(x_ref,
               w0_ref, b0_ref,
               w1_ref, b1_ref,
               w2_ref, b2_ref,
               w3_ref, b3_ref,
               o_ref):
    """Fused 4-layer MLP: three Linear+ReLU blocks followed by a plain Linear.

    Matmul inputs are bf16 (MXU-native); accumulation and biases are f32.
    """
    x = x_ref[...].astype(jnp.bfloat16)

    h = jnp.dot(x, w0_ref[...], preferred_element_type=jnp.float32) + b0_ref[...]
    h = jnp.maximum(h, 0.0).astype(jnp.bfloat16)

    h = jnp.dot(h, w1_ref[...], preferred_element_type=jnp.float32) + b1_ref[...]
    h = jnp.maximum(h, 0.0).astype(jnp.bfloat16)

    h = jnp.dot(h, w2_ref[...], preferred_element_type=jnp.float32) + b2_ref[...]
    h = jnp.maximum(h, 0.0).astype(jnp.bfloat16)

    out = jnp.dot(h, w3_ref[...], preferred_element_type=jnp.float32) + b3_ref[...]
    o_ref[...] = out.astype(o_ref.dtype)


def init_linear_params(key, in_dim, out_dim):
    """Deterministic PyTorch-style nn.Linear init: U(-1/sqrt(in), 1/sqrt(in))."""
    kw, kb = jax.random.split(key)
    bound = 1.0 / math.sqrt(in_dim)
    # stored PyTorch-style (out, in); transposed once in prepare_params
    w = jax.random.uniform(kw, (out_dim, in_dim), jnp.float32, -bound, bound)
    b = jax.random.uniform(kb, (1, out_dim), jnp.float32, -bound, bound)
    return w, b


def make_mlp_params(key, input_dim, output_dim, dim):
    keys = jax.random.split(key, 4)
    p0 = init_linear_params(keys[0], input_dim, input_dim)
    p1 = init_linear_params(keys[1], input_dim, dim)
    p2 = init_linear_params(keys[2], dim, dim)
    p3 = init_linear_params(keys[3], dim, output_dim)
    return (p0, p1, p2, p3)


def prepare_params(params):
    """One-time (outside jit): transpose weights to (in, out) and cast to bf16.

    Biases stay f32 (added to the f32 matmul accumulator).
    """
    return tuple(
        (jnp.asarray(w.T, jnp.bfloat16), jnp.asarray(b, jnp.float32))
        for (w, b) in params
    )


# --- batch tiling policy -----------------------------------------------------
# Gridless single call for small B (everything resident in VMEM, zero grid-step
# overhead). Beyond that: an EVEN number (>=2) of equal batch tiles, each a
# multiple of 8 rows and capped near _TM_MAX, with B padded up to n_steps*tm.
#   * v5e/v6e: serial grid -> big tiles minimize step count (0.35 us/step).
#   * v7x: even "parallel" grid shards cleanly across both TensorCores.
_GRIDLESS_MAX_B = 1024
_TM_MAX = 4096


def _round_up(x, m):
    return ((x + m - 1) // m) * m


def _choose_grid(B):
    """Return (tm, n_steps, padded_B) with n_steps even and tm a multiple of 8."""
    n_steps = 2 * max(1, -(-B // (2 * _TM_MAX)))   # even, >= 2
    tm = _round_up(-(-B // n_steps), 8)
    return tm, n_steps, tm * n_steps


@jax.jit
def mlp_forward(style0, kparams):
    (w0, b0), (w1, b1), (w2, b2), (w3, b3) = kparams
    B = style0.shape[0]
    x = style0.reshape(B, -1)  # style0.view(B, -1)
    in_dim = x.shape[1]
    output_dim = w3.shape[1]

    if B <= _GRIDLESS_MAX_B:
        # Small/medium batch: x + out + ~8 KiB of weights is well under VMEM;
        # one gridless call, whole problem resident, no per-step overhead.
        vmem = pl.BlockSpec(memory_space=pltpu.MemorySpace.VMEM)
        return pl.pallas_call(
            mlp_kernel,
            out_shape=jax.ShapeDtypeStruct((B, output_dim), jnp.float32),
            in_specs=[vmem] * 9,
            out_specs=vmem,
        )(x, w0, b0, w1, b1, w2, b2, w3, b3)

    # Large batch: even-count 1-D grid over big batch tiles. Weights/biases use
    # constant index_maps (stay VMEM-resident across grid steps); activations
    # are pipelined. B is padded to n_steps*tm and the result sliced back.
    tm, n_steps, padded_B = _choose_grid(B)
    if padded_B != B:
        x = jnp.pad(x, ((0, padded_B - B), (0, 0)))

    def const_spec(a):
        return pl.BlockSpec(a.shape, lambda i: (0, 0))

    out = pl.pallas_call(
        mlp_kernel,
        out_shape=jax.ShapeDtypeStruct((padded_B, output_dim), jnp.float32),
        grid=(n_steps,),
        in_specs=[pl.BlockSpec((tm, in_dim), lambda i: (i, 0)),
                  const_spec(w0), const_spec(b0),
                  const_spec(w1), const_spec(b1),
                  const_spec(w2), const_spec(b2),
                  const_spec(w3), const_spec(b3)],
        out_specs=pl.BlockSpec((tm, output_dim), lambda i: (i, 0)),
        compiler_params=pltpu.CompilerParams(
            dimension_semantics=("parallel",)),
    )(x, w0, b0, w1, b1, w2, b2, w3, b3)

    if padded_B != B:
        out = out[:B]
    return out


def mlp_reference_f32(style0, params):
    """Full-f32 reference matching the PyTorch module semantics."""
    (w0, b0), (w1, b1), (w2, b2), (w3, b3) = params
    B = style0.shape[0]
    x = style0.reshape(B, -1)
    h = jnp.maximum(x @ w0.T + b0, 0.0)
    h = jnp.maximum(h @ w1.T + b1, 0.0)
    h = jnp.maximum(h @ w2.T + b2, 0.0)
    return h @ w3.T + b3


def mlp_reference_bf16(style0, kparams):
    """Reference with the same bf16-input / f32-accumulate scheme as the kernel."""
    (w0, b0), (w1, b1), (w2, b2), (w3, b3) = kparams
    B = style0.shape[0]
    x = style0.reshape(B, -1).astype(jnp.bfloat16)
    h = jnp.dot(x, w0, preferred_element_type=jnp.float32) + b0
    h = jnp.maximum(h, 0.0).astype(jnp.bfloat16)
    h = jnp.dot(h, w1, preferred_element_type=jnp.float32) + b1
    h = jnp.maximum(h, 0.0).astype(jnp.bfloat16)
    h = jnp.dot(h, w2, preferred_element_type=jnp.float32) + b2
    h = jnp.maximum(h, 0.0).astype(jnp.bfloat16)
    return jnp.dot(h, w3, preferred_element_type=jnp.float32) + b3


if __name__ == "__main__":
    # MLP(input_dim=16, output_dim=8, dim=32, n_blk=4, norm='none', activ='relu')
    B = 2
    input_dim = 16
    dim = 32
    output_dim = 8

    key = jax.random.PRNGKey(0)
    k_params, k_x, k_x2, k_x3 = jax.random.split(key, 4)

    params = make_mlp_params(k_params, input_dim, output_dim, dim)
    kparams = prepare_params(params)  # one-time transpose + bf16 cast, outside jit

    # style0 as a 4-D tensor that the forward flattens: (2, 1, 4, 4) -> (2, 16)
    style0 = jax.random.normal(k_x, (B, 1, 4, 4), jnp.float32)

    out = jax.block_until_ready(mlp_forward(style0, kparams))
    assert out.shape == (B, output_dim)
    ref_bf16 = mlp_reference_bf16(style0, kparams)
    ref_f32 = mlp_reference_f32(style0, params)
    assert jnp.allclose(out, ref_bf16, atol=1e-3, rtol=1e-3), "mismatch vs bf16 reference"
    assert jnp.allclose(out, ref_f32, atol=5e-2, rtol=5e-2), "mismatch vs f32 reference"

    # B=256 now takes the gridless whole-problem-in-VMEM path (no grid steps).
    B2 = 256
    style0_med = jax.random.normal(k_x2, (B2, 1, 4, 4), jnp.float32)
    out_med = jax.block_until_ready(mlp_forward(style0_med, kparams))
    assert out_med.shape == (B2, output_dim)
    assert jnp.allclose(out_med, mlp_reference_bf16(style0_med, kparams),
                        atol=1e-3, rtol=1e-3), "gridless path: mismatch vs bf16 reference"
    assert jnp.allclose(out_med, mlp_reference_f32(style0_med, params),
                        atol=5e-2, rtol=5e-2), "gridless path: mismatch vs f32 reference"

    # Awkward B exercises the padded even-step grid path (2 tiles of 1504 rows).
    B3 = 3000
    style0_big = jax.random.normal(k_x3, (B3, 1, 4, 4), jnp.float32)
    out_big = jax.block_until_ready(mlp_forward(style0_big, kparams))
    assert out_big.shape == (B3, output_dim)
    assert jnp.allclose(out_big, mlp_reference_bf16(style0_big, kparams),
                        atol=1e-3, rtol=1e-3), "grid path: mismatch vs bf16 reference"
    assert jnp.allclose(out_big, mlp_reference_f32(style0_big, params),
                        atol=5e-2, rtol=5e-2), "grid path: mismatch vs f32 reference"

    print("KERNEL_OK")
</pallas_src>

<mosaic_0001>
module attributes {stable_mosaic.version = 11 : i64} {
  func.func @mlp_kernel(%arg0: memref<2x16xf32, #tpu.memory_space<vmem>>, %arg1: memref<16x16xbf16, #tpu.memory_space<vmem>>, %arg2: memref<1x16xf32, #tpu.memory_space<vmem>>, %arg3: memref<16x32xbf16, #tpu.memory_space<vmem>>, %arg4: memref<1x32xf32, #tpu.memory_space<vmem>>, %arg5: memref<32x32xbf16, #tpu.memory_space<vmem>>, %arg6: memref<1x32xf32, #tpu.memory_space<vmem>>, %arg7: memref<32x8xbf16, #tpu.memory_space<vmem>>, %arg8: memref<1x8xf32, #tpu.memory_space<vmem>>, %arg9: memref<2x8xf32, #tpu.memory_space<vmem>>) attributes {dimension_semantics = [], scalar_prefetch = 0 : i64, scratch_operands = 0 : i64, tpu.core_type = #tpu.core_type<tc>} {
    %c0 = arith.constant 0 : index
    %c0_0 = arith.constant 0 : index
    %0 = vector.load %arg0[%c0, %c0_0] : memref<2x16xf32, #tpu.memory_space<vmem>>, vector<2x16xf32>
    %1 = arith.truncf %0 : vector<2x16xf32> to vector<2x16xbf16>
    %c0_1 = arith.constant 0 : index
    %c0_2 = arith.constant 0 : index
    %2 = vector.load %arg1[%c0_1, %c0_2] : memref<16x16xbf16, #tpu.memory_space<vmem>>, vector<16x16xbf16>
    %cst = arith.constant dense<0.000000e+00> : vector<2x16xf32>
    %3 = tpu.matmul %1, %2, %cst {dimension_numbers = #tpu.dot_dimension_numbers<[1], [0], [0], [1], [0, 0, 1, 1], [], []>} : vector<2x16xbf16>, vector<16x16xbf16>, vector<2x16xf32> -> vector<2x16xf32>
    %c0_3 = arith.constant 0 : index
    %c0_4 = arith.constant 0 : index
    %4 = vector.load %arg2[%c0_3, %c0_4] : memref<1x16xf32, #tpu.memory_space<vmem>>, vector<1x16xf32>
    %5 = vector.broadcast %4 : vector<1x16xf32> to vector<2x16xf32>
    %6 = arith.addf %3, %5 : vector<2x16xf32>
    %cst_5 = arith.constant 0.000000e+00 : f32
    %7 = vector.broadcast %cst_5 : f32 to vector<2x16xf32>
    %8 = arith.maximumf %6, %7 : vector<2x16xf32>
    %9 = arith.truncf %8 : vector<2x16xf32> to vector<2x16xbf16>
    %c0_6 = arith.constant 0 : index
    %c0_7 = arith.constant 0 : index
    %10 = vector.load %arg3[%c0_6, %c0_7] : memref<16x32xbf16, #tpu.memory_space<vmem>>, vector<16x32xbf16>
    %cst_8 = arith.constant dense<0.000000e+00> : vector<2x32xf32>
    %11 = tpu.matmul %9, %10, %cst_8 {dimension_numbers = #tpu.dot_dimension_numbers<[1], [0], [0], [1], [0, 0, 1, 1], [], []>} : vector<2x16xbf16>, vector<16x32xbf16>, vector<2x32xf32> -> vector<2x32xf32>
    %c0_9 = arith.constant 0 : index
    %c0_10 = arith.constant 0 : index
    %12 = vector.load %arg4[%c0_9, %c0_10] : memref<1x32xf32, #tpu.memory_space<vmem>>, vector<1x32xf32>
    %13 = vector.broadcast %12 : vector<1x32xf32> to vector<2x32xf32>
    %14 = arith.addf %11, %13 : vector<2x32xf32>
    %cst_11 = arith.constant 0.000000e+00 : f32
    %15 = vector.broadcast %cst_11 : f32 to vector<2x32xf32>
    %16 = arith.maximumf %14, %15 : vector<2x32xf32>
    %17 = arith.truncf %16 : vector<2x32xf32> to vector<2x32xbf16>
    %c0_12 = arith.constant 0 : index
    %c0_13 = arith.constant 0 : index
    %18 = vector.load %arg5[%c0_12, %c0_13] : memref<32x32xbf16, #tpu.memory_space<vmem>>, vector<32x32xbf16>
    %cst_14 = arith.constant dense<0.000000e+00> : vector<2x32xf32>
    %19 = tpu.matmul %17, %18, %cst_14 {dimension_numbers = #tpu.dot_dimension_numbers<[1], [0], [0], [1], [0, 0, 1, 1], [], []>} : vector<2x32xbf16>, vector<32x32xbf16>, vector<2x32xf32> -> vector<2x32xf32>
    %c0_15 = arith.constant 0 : index
    %c0_16 = arith.constant 0 : index
    %20 = vector.load %arg6[%c0_15, %c0_16] : memref<1x32xf32, #tpu.memory_space<vmem>>, vector<1x32xf32>
    %21 = vector.broadcast %20 : vector<1x32xf32> to vector<2x32xf32>
    %22 = arith.addf %19, %21 : vector<2x32xf32>
    %cst_17 = arith.constant 0.000000e+00 : f32
    %23 = vector.broadcast %cst_17 : f32 to vector<2x32xf32>
    %24 = arith.maximumf %22, %23 : vector<2x32xf32>
    %25 = arith.truncf %24 : vector<2x32xf32> to vector<2x32xbf16>
    %c0_18 = arith.constant 0 : index
    %c0_19 = arith.constant 0 : index
    %26 = vector.load %arg7[%c0_18, %c0_19] : memref<32x8xbf16, #tpu.memory_space<vmem>>, vector<32x8xbf16>
    %cst_20 = arith.constant dense<0.000000e+00> : vector<2x8xf32>
    %27 = tpu.matmul %25, %26, %cst_20 {dimension_numbers = #tpu.dot_dimension_numbers<[1], [0], [0], [1], [0, 0, 1, 1], [], []>} : vector<2x32xbf16>, vector<32x8xbf16>, vector<2x8xf32> -> vector<2x8xf32>
    %c0_21 = arith.constant 0 : index
    %c0_22 = arith.constant 0 : index
    %28 = vector.load %arg8[%c0_21, %c0_22] : memref<1x8xf32, #tpu.memory_space<vmem>>, vector<1x8xf32>
    %29 = vector.broadcast %28 : vector<1x8xf32> to vector<2x8xf32>
    %30 = arith.addf %27, %29 : vector<2x8xf32>
    %c0_23 = arith.constant 0 : index
    %c0_24 = arith.constant 0 : index
    %31 = vector.load %arg9[%c0_23, %c0_24] : memref<2x8xf32, #tpu.memory_space<vmem>>, vector<2x8xf32>
    tpu.vector_store %arg9[%c0_23, %c0_24], %30 {strides = array<i32>} : memref<2x8xf32, #tpu.memory_space<vmem>>, vector<2x8xf32>,
    return
  }
}

</mosaic_0001>

<bundles_post_ra>
// kernel: mlp_forward.1
= control target key start
LH: loop header
LB: loop body
LE: loop exit
PB: predicated region body
PF: predicated region fallthrough
CT: control target
= control target key end

     0   :  { %v393_v1 = vmov 0.0   ;;  %vm51_vm0 = vcmask 130048   ;;  %vm394_vm1 = vmmov 0   ;;  %s497_s0 = inlined_call_operand.vmem [shape: f32[2,16], index: 0, kind: input, shape index: {}]   ;;  %s498_s1 = inlined_call_operand.vmem [shape: bf16[16,16], index: 1, kind: input, shape index: {}]   ;;  %s499_s2 = inlined_call_operand.vmem [shape: f32[1,16], index: 2, kind: input, shape index: {}]   ;;  %s500_s3 = inlined_call_operand.vmem [shape: bf16[16,32], index: 3, kind: input, shape index: {}]   ;;  %s501_s4 = inlined_call_operand.vmem [shape: f32[1,32], index: 4, kind: input, shape index: {}]   ;;  %s502_s5 = inlined_call_operand.vmem [shape: bf16[32,32], index: 5, kind: input, shape index: {}]   ;;  %s503_s6 = inlined_call_operand.vmem [shape: f32[1,32], index: 6, kind: input, shape index: {}]   ;;  %s504_s7 = inlined_call_operand.vmem [shape: bf16[32,8], index: 7, kind: input, shape index: {}]   ;;  %s505_s8 = inlined_call_operand.vmem [shape: f32[1,8], index: 8, kind: input, shape index: {}]   ;;  %s506_s9 = inlined_call_operand.hbm [shape: f32[2,8], index: 9, kind: output, shape index: {}]  }
   0x1   :  { %v363_v0 = vld [vmem:[%s498_s1] sm:$0xff]   ;;  %332 = vmatprep.subr.bf16.mxu0 %v393_v1  ;;  %338 = vmatprep.subr.bf16.mxu1 %v393_v1 }
   0x2   :  { %v34_v2 = vld [vmem:[%s497_s0] sm:$0x3]  ;;  %333 = vmatpush3.bf16.msra.mxu0 %v363_v0  ;;  %334 = vmatprep.mubr.msk.bf16.mxu0 %vm394_vm1, %v393_v1 }
   0x3   :  { %v35_v3 = vpack.c.bf16 %v34_v2, %v34_v2  ;;  %340 = vmatprep.mubr.msk.bf16.mxu1 %vm394_vm1, %v393_v1  ;;  %344 = vmatprep.subr.bf16.mxu0 %v393_v1 }
   0x5   :  { %335 = vmatmul.mubr.msk.bf16.vlgmr.msra.gmra.mrb[0].mxu0 %vm51_vm0, %v35_v3 }
   0x6   :  { %14 = vsyncpa [#allocation3], 0  ;;  %348 = vmatprep.mubr.msk.bf16.mxu0 %vm394_vm1, %v393_v1  ;;  %v364_v4 = vld [vmem:[%s500_s3] sm:$0xff]   ;;  %v366_v14 = vld [vmem:[%s502_s5 + $0x8] sm:$0xff]   ;;  %vm180_vm2 = vcmask 261120   ;;  %s395_s25 = smov [#allocation2]  }
   0x7   :  { %339 = vmatpush3.bf16.msra.mxu1 %v364_v4  ;;  %v365_v5 = vld [vmem:[%s502_s5] sm:$0xff]   ;;  %v368_v24 = vld [vmem:[%s504_s7 + $0x8] sm:$0xff]   ;;  %s300_s26 = sshll.u32 %s395_s25, 4  ;;  %vm292_vm3 = vcmask 58368   ;;  %s301_s26 = int_to_ptr.vmem [resolvable:$true] %s300_s26 }
   0x8   :  { %352 = vmatprep.subr.bf16.mxu1 %v393_v1  ;;  %345 = vmatpush3.bf16.msra.mxu0 %v365_v5  ;;  %v308_v6 = vld [vmem:[%s499_s2] ss:$0 sm:$0xff]  ;;  %p374_p1 = scmp.lt.s32.totalorder %s301_s26, %s301_s26 }
   0x9   :  { %346 = vmatprep.subr.bf16.mxu0 %v393_v1  ;;  %v367_v15 = vld [vmem:[%s504_s7] sm:$0xff]  }
   0xa   :  { %v311_v16 = vld [vmem:[%s501_s4] ss:$0 sm:$0xff] }
   0xb   :  { %v314_v25 = vld [vmem:[%s503_s6] ss:$0 sm:$0xff]  ;;  %s369_s6 = scalar_lea.vmem %s301_s26, 32 }
   0xc   :  { %347 = vmatpush3.bf16.msra.mxu0 %v366_v14  ;;  %v318_v33 = vld [vmem:[%s505_s8] ss:$0 sm:$0xff]  ;;  %p370_p0 = scmp.ne.s32.totalorder %s301_s26, %s369_s6  ;;  %p375_p2 = scmp.lt.s32.totalorder %s369_s6, %s369_s6 }
   0xe   :  { %p376_p3 = por %p375_p2, %p374_p1 }
  0x10   :  { %p377_p4 = pnand %p376_p3, %p370_p0 }
  0xd8   :  { %v89_v7 = vpop.f32.mrb[0].mxu0 }
  0xd9   :  { %v90_v8 = vadd.f32 %v308_v6, %v89_v7  ;;  %v336_v9 = vpop.f32.mrb[1].mxu0 }
  0xda   :  { %v92_v10 = vpop.f32.mrb[2].mxu0 }
  0xdb   :  { %v95_v11 = vmax.f32 %v90_v8, 0.0  ;;  %v337_v12 = vpop.f32.mrb[3].mxu0 }
  0xdd   :  { %v96_v13 = vpack.c.bf16 %v95_v11, %v95_v11 }
  0xdf   :  { %341 = vmatmul.mubr.msk.bf16.vlgmr.msra.gmra.mrb[0].mxu1 %vm51_vm0, %v96_v13 }
  0xe0   :  { %356 = vmatprep.mubr.msk.bf16.mxu1 %vm394_vm1, %v393_v1  ;;  %353 = vmatpush3.bf16.msra.mxu1 %v367_v15 }
  0xe1   :  { %354 = vmatprep.subr.bf16.mxu1 %v393_v1 }
  0xe4   :  { %355 = vmatpush3.bf16.msra.mxu1 %v368_v24 }
 0x1b2   :  { %v149_v17 = vpop.f32.mrb[0].mxu1 }
 0x1b3   :  { %v150_v18 = vadd.f32 %v311_v16, %v149_v17  ;;  %v342_v19 = vpop.f32.mrb[1].mxu1 }
 0x1b4   :  { %v152_v20 = vpop.f32.mrb[2].mxu1 }
 0x1b5   :  { %v155_v21 = vmax.f32 %v150_v18, 0.0  ;;  %v343_v22 = vpop.f32.mrb[3].mxu1 }
 0x1b7   :  { %v156_v23 = vpack.c.bf16 %v155_v21, %v155_v21 }
 0x1b9   :  { %349 = vmatmul.mubr.msk.bf16.vlgmr.msra.gmra.mrb[4].mxu0 %vm180_vm2, %v156_v23 }
 0x28c   :  { %v218_v26 = vpop.f32.mrb[4].mxu0 }
 0x28d   :  { %v219_v27 = vadd.f32 %v314_v25, %v218_v26  ;;  %v350_v28 = vpop.f32.mrb[5].mxu0 }
 0x28e   :  { %v221_v29 = vpop.f32.mrb[6].mxu0 }
 0x28f   :  { %v224_v30 = vmax.f32 %v219_v27, 0.0  ;;  %v351_v31 = vpop.f32.mrb[7].mxu0 }
 0x291   :  { %v225_v32 = vpack.c.bf16 %v224_v30, %v224_v30 }
 0x293   :  { %357 = vmatmul.mubr.msk.bf16.vlgmr.msra.gmra.mrb[4].mxu1 %vm180_vm2, %v225_v32 }
 0x366   :  { %v286_v34 = vpop.f32.mrb[4].mxu1 }
 0x367   :  { %v287_v35 = vadd.f32 %v318_v33, %v286_v34  ;;  %v358_v36 = vpop.f32.mrb[5].mxu1 }
 0x368   :  { %v289_v37 = vpop.f32.mrb[6].mxu1 }
 0x369   :  { %v359_v38 = vpop.f32.mrb[7].mxu1  ;;  %293 = vst.msk [vmem:[#allocation2] sm:$0x3] %vm292_vm3, %v287_v35 }
 0x36a   :  { %380 = shalt.err (!%p377_p4)
}
 0x36b   :  { %s381_s8 = scalar_lea.hbm %s506_s9, 32 }
 0x36c   :  { %p382_p5 = scmp.ne.s32.totalorder %s506_s9, %s381_s8  ;;  %p385_p6 = scmp.lt.u32.totalorder %s381_s8, %s506_s9 }
 0x36e   :  { %p387_p7 = pnand %p385_p6, %p382_p5 }
 0x370   :  { %390 = shalt.err (!%p387_p7)
}
 0x371   :  { %303 = dma.vmem_to_hbm [thread:$0]  %s301_s26, 32, %s506_s9, [#allocation3]  }
 0x372   :  { %391 = dma.done.wait [#allocation3], 32  }
 0x373   :  { %392 = vsyncadd [#allocation3], 4294967264 }
 0x374   :  { %307 = vsyncpa [#allocation3], 1 }

</bundles_post_ra>
